<compile_context>
chip_gen: v5e
topology: v5e:2x2
jax: 0.10.0
libtpu: 0.0.40
codegen_flags: <defaults>
</compile_context>

<pallas_src>
import functools

import jax
import jax.numpy as jnp
from jax.experimental import pallas as pl
from jax.experimental.pallas import tpu as pltpu

K_SIZE = 5
STRIDE = 2


def conv2d_size_out(size, kernel_size=K_SIZE, stride=STRIDE):
    return (size - (kernel_size - 1) - 1) // stride + 1


# ----------------------------------------------------------------------------
# Fused Pallas kernel: full DQN forward for one batch-block per grid step.
# ----------------------------------------------------------------------------
def _dqn_fused_kernel(cols_ref, w1_ref, s1_ref, t1_ref,
                      w2_ref, s2_ref, t2_ref,
                      fc1w_ref, fc1b_ref, headw_ref, headb_ref,
                      o_ref, patch_ref,
                      *, bsz, k, stride, w1o, h2, w2, c1_out, c2_out):
    f32 = jnp.float32

    # ---- conv1 + bn1 + relu : one (36*B, 100) @ (100, 16) MXU matmul --------
    y1 = jnp.dot(cols_ref[0], w1_ref[...], preferred_element_type=f32)
    y1 = jnp.maximum(y1 * s1_ref[...] + t1_ref[...], 0.0)     # (36*B, 16) f32

    # Hoisted weights / epilogue constants (loaded once per grid step).
    w2m = w2_ref[...]                                          # (k*k*16, 32) bf16
    s2 = s2_ref[...]
    t2 = t2_ref[...]
    fc1w = fc1w_ref[...]                                       # (hw2*32, 128) bf16
    headw = headw_ref[...]                                     # (128, 128) bf16

    # ---- conv2 + bn2 + relu  (one big matmul per output position) and fc1 ---
    # y1 rows are position-major inside the block (row = p1*B + b_local), so every
    # conv2 patch is a static (B, 16) sublane slice; we pack the 25 slices into a
    # lane-contiguous (B, k*k*16) scratch slab and do ONE (B,400)@(400,32) matmul.
    h_acc = None
    for oh in range(h2):
        for ow in range(w2):
            for i in range(k):
                for j in range(k):
                    r0 = ((oh * stride + i) * w1o + (ow * stride + j)) * bsz
                    p = i * k + j
                    patch_ref[:, p * c1_out:(p + 1) * c1_out] = y1[r0:r0 + bsz, :]
            patches = patch_ref[...].astype(w2m.dtype)         # (B, k*k*16) bf16
            z = jnp.dot(patches, w2m, preferred_element_type=f32)
            y2 = jnp.maximum(z * s2 + t2, 0.0)                 # (B, 32) f32
            q = oh * w2 + ow
            contrib = jnp.dot(y2.astype(fc1w.dtype),
                              fc1w[q * c2_out:(q + 1) * c2_out, :],
                              preferred_element_type=f32)      # (B, 128)
            h_acc = contrib if h_acc is None else h_acc + contrib

    h = jnp.maximum(h_acc + fc1b_ref[...], 0.0)                # (B, 128) f32

    # ---- head (lane-dense 128-wide padded output) ----------------------------
    o_ref[0] = (jnp.dot(h.astype(headw.dtype), headw,
                        preferred_element_type=f32) + headb_ref[...])


# ----------------------------------------------------------------------------
# Host-side layout prep (plain JAX): im2col of the raw input only.
# ----------------------------------------------------------------------------
def im2col(x_nhwc, k, stride):
    """x: (N, H, W, C) -> (N, Ho*Wo, k*k*C), patch ordering (kh, kw, c)."""
    N, H, W, C = x_nhwc.shape
    Ho = (H - k) // stride + 1
    Wo = (W - k) // stride + 1
    patches = []
    for i in range(k):
        for j in range(k):
            patches.append(
                x_nhwc[:, i:i + stride * Ho:stride, j:j + stride * Wo:stride, :])
    cols = jnp.stack(patches, axis=3)                 # (N, Ho, Wo, k*k, C)
    return cols.reshape(N, Ho * Wo, k * k * C), Ho, Wo


def bn_fold(gamma, beta, running_mean, running_var, eps=1e-5):
    scale = gamma / jnp.sqrt(running_var + eps)
    shift = beta - running_mean * scale
    return scale, shift


def _pick_batch_block(n):
    # ~128 images per grid step for large N; for small N keep >=2 grid steps when
    # possible (v7x has 2 TensorCores) and B even (keeps 36*B sublane-aligned).
    if n >= 256:
        return 128
    b = max(2, -(-n // 2))
    return b + (b & 1)


# ----------------------------------------------------------------------------
# Forward pass (DQN.forward) — one pallas_call
# ----------------------------------------------------------------------------
def _dqn_forward(params, x_nchw):
    k, stride = K_SIZE, STRIDE
    N, c, h, w = x_nchw.shape
    c1_out = params["w1"].shape[-1]                    # 16
    c2_out = params["w2"].shape[-1]                    # 32
    n_fc1 = params["fc1_w"].shape[1]                   # 128
    n_out = params["head_w"].shape[1]

    x = jnp.transpose(x_nchw, (0, 2, 3, 1)).astype(jnp.float32)   # NCHW -> NHWC

    # conv1 im2col (host-side layout prep).  NO pad to 128: K stays k*k*c.
    cols, h1, w1o = im2col(x, k, stride)               # (N, h1*w1, k*k*c)
    s1len = h1 * w1o
    kk = cols.shape[-1]

    h2 = conv2d_size_out(h1)
    w2 = conv2d_size_out(w1o)
    assert h2 >= 1 and w2 >= 1
    hw2 = h2 * w2

    # Batch blocking: B images per grid step, position-major rows inside a block.
    bsz = _pick_batch_block(N)
    grid = -(-N // bsz)
    n_pad = grid * bsz
    cols = jnp.pad(cols, ((0, n_pad - N), (0, 0), (0, 0)))
    cols_blk = (cols.reshape(grid, bsz, s1len, kk)
                    .transpose(0, 2, 1, 3)             # (grid, s1len, B, kk)
                    .reshape(grid, s1len * bsz, kk)
                    .astype(jnp.bfloat16))

    # conv1 weights -> (k*k*c, 16) matmul matrix (bf16).
    w1_m = params["w1"].reshape(kk, c1_out).astype(jnp.bfloat16)

    # Fold BN (eval mode) + conv bias into per-channel scale/shift (f32 epilogue).
    s1, t1 = bn_fold(params["bn1_gamma"], params["bn1_beta"],
                     params["bn1_mean"], params["bn1_var"])
    t1 = t1 + params["b1"] * s1
    s2, t2 = bn_fold(params["bn2_gamma"], params["bn2_beta"],
                     params["bn2_mean"], params["bn2_var"])
    t2 = t2 + params["b2"] * s2

    # conv2 weights as one contiguous (k*k*16, 32) matrix (bf16).
    w2_m = params["w2"].reshape(k * k * c1_out, c2_out).astype(jnp.bfloat16)

    # Fold PyTorch's NCHW flatten into fc1_w: kernel consumes (oh, ow, c) order.
    rows = jnp.arange(hw2 * c2_out)
    fc1w_k = params["fc1_w"][(rows % c2_out) * hw2 + rows // c2_out, :]
    fc1w_k = fc1w_k.astype(jnp.bfloat16)

    # Lane-dense head: zero-pad output columns to a multiple of 128.
    n_out_p = ((n_out + 127) // 128) * 128
    head_w_p = jnp.pad(params["head_w"],
                       ((0, 0), (0, n_out_p - n_out))).astype(jnp.bfloat16)
    head_b_p = jnp.pad(params["head_b"].reshape(1, n_out),
                       ((0, 0), (0, n_out_p - n_out))).astype(jnp.float32)

    kernel = functools.partial(_dqn_fused_kernel, bsz=bsz, k=k, stride=stride,
                               w1o=w1o, h2=h2, w2=w2,
                               c1_out=c1_out, c2_out=c2_out)

    out = pl.pallas_call(
        kernel,
        out_shape=jax.ShapeDtypeStruct((grid, bsz, n_out_p), jnp.float32),
        grid=(grid,),
        in_specs=[
            pl.BlockSpec((1, s1len * bsz, kk), lambda g: (g, 0, 0)),    # cols block
            pl.BlockSpec((kk, c1_out), lambda g: (0, 0)),               # w1
            pl.BlockSpec((1, c1_out), lambda g: (0, 0)),                # bn1 scale
            pl.BlockSpec((1, c1_out), lambda g: (0, 0)),                # bn1 shift(+bias)
            pl.BlockSpec((k * k * c1_out, c2_out), lambda g: (0, 0)),   # w2 (2-D)
            pl.BlockSpec((1, c2_out), lambda g: (0, 0)),                # bn2 scale
            pl.BlockSpec((1, c2_out), lambda g: (0, 0)),                # bn2 shift(+bias)
            pl.BlockSpec((hw2 * c2_out, n_fc1), lambda g: (0, 0)),      # fc1 w (permuted)
            pl.BlockSpec((1, n_fc1), lambda g: (0, 0)),                 # fc1 b
            pl.BlockSpec((n_fc1, n_out_p), lambda g: (0, 0)),           # head w (padded)
            pl.BlockSpec((1, n_out_p), lambda g: (0, 0)),               # head b (padded)
        ],
        out_specs=pl.BlockSpec((1, bsz, n_out_p), lambda g: (g, 0, 0)),
        scratch_shapes=[pltpu.VMEM((bsz, k * k * c1_out), jnp.float32)],
        compiler_params=pltpu.CompilerParams(
            dimension_semantics=("parallel",)),
    )(cols_blk, w1_m,
      s1.reshape(1, c1_out), t1.reshape(1, c1_out),
      w2_m, s2.reshape(1, c2_out), t2.reshape(1, c2_out),
      fc1w_k, params["fc1_b"].reshape(1, n_fc1).astype(jnp.float32),
      head_w_p, head_b_p)

    return out.reshape(n_pad, n_out_p)[:N, :n_out]


dqn_forward = jax.jit(_dqn_forward)


# ----------------------------------------------------------------------------
# Parameter construction (deterministic, synthetic)
# ----------------------------------------------------------------------------
def init_params(key, c, h, w, outputs):
    k = K_SIZE
    conv_w = conv2d_size_out(w)
    conv_h = conv2d_size_out(h)
    conv_w2 = conv2d_size_out(conv_w)
    conv_h2 = conv2d_size_out(conv_h)
    linear_input_size = conv_w2 * conv_h2 * 32

    keys = jax.random.split(key, 12)
    p = {}
    # conv1: 16 filters, 5x5, c in-channels  (HWIO layout)
    p["w1"] = 0.05 * jax.random.normal(keys[0], (k, k, c, 16), jnp.float32)
    p["b1"] = 0.01 * jax.random.normal(keys[1], (16,), jnp.float32)
    p["bn1_gamma"] = 1.0 + 0.1 * jax.random.normal(keys[2], (16,), jnp.float32)
    p["bn1_beta"] = 0.1 * jax.random.normal(keys[3], (16,), jnp.float32)
    p["bn1_mean"] = 0.05 * jax.random.normal(keys[4], (16,), jnp.float32)
    p["bn1_var"] = 1.0 + 0.1 * jax.random.uniform(keys[5], (16,), jnp.float32)
    # conv2: 32 filters, 5x5, 16 in-channels
    p["w2"] = 0.05 * jax.random.normal(keys[6], (k, k, 16, 32), jnp.float32)
    p["b2"] = 0.01 * jax.random.normal(keys[7], (32,), jnp.float32)
    p["bn2_gamma"] = 1.0 + 0.1 * jax.random.normal(keys[8], (32,), jnp.float32)
    p["bn2_beta"] = 0.1 * jax.random.normal(keys[9], (32,), jnp.float32)
    p["bn2_mean"] = 0.05 * jax.random.normal(keys[10], (32,), jnp.float32)
    p["bn2_var"] = 1.0 + 0.1 * jax.random.uniform(keys[11], (32,), jnp.float32)
    # fc1 / head (fc1_w rows are in PyTorch NCHW-flatten order: (c, oh, ow))
    k2 = jax.random.split(keys[11], 4)
    p["fc1_w"] = 0.05 * jax.random.normal(k2[0], (linear_input_size, 128), jnp.float32)
    p["fc1_b"] = 0.01 * jax.random.normal(k2[1], (128,), jnp.float32)
    p["head_w"] = 0.05 * jax.random.normal(k2[2], (128, outputs), jnp.float32)
    p["head_b"] = 0.01 * jax.random.normal(k2[3], (outputs,), jnp.float32)
    return p


# ----------------------------------------------------------------------------
# Pure-JAX f32 reference for validation
# ----------------------------------------------------------------------------
def dqn_reference(params, x_nchw):
    x = jnp.transpose(x_nchw, (0, 2, 3, 1))
    dn = ("NHWC", "HWIO", "NHWC")

    def conv_bn_relu(x, w, b, g, beta, mean, var):
        y = jax.lax.conv_general_dilated(x, w, (STRIDE, STRIDE), "VALID",
                                         dimension_numbers=dn) + b
        s, t = bn_fold(g, beta, mean, var)
        return jnp.maximum(y * s + t, 0.0)

    y1 = conv_bn_relu(x, params["w1"], params["b1"], params["bn1_gamma"],
                      params["bn1_beta"], params["bn1_mean"], params["bn1_var"])
    y2 = conv_bn_relu(y1, params["w2"], params["b2"], params["bn2_gamma"],
                      params["bn2_beta"], params["bn2_mean"], params["bn2_var"])
    flat = jnp.transpose(y2, (0, 3, 1, 2)).reshape(x.shape[0], -1)   # NCHW flatten
    h = jnp.maximum(flat @ params["fc1_w"] + params["fc1_b"], 0.0)
    return h @ params["head_w"] + params["head_b"]


if __name__ == "__main__":
    # Small shapes consistent with the module: batch=2, c=4, h=w=16, outputs=2
    batch, c, h, w, outputs = 2, 4, 16, 16, 2
    key = jax.random.PRNGKey(0)
    k_x, k_p = jax.random.split(key)
    x = jax.random.normal(k_x, (batch, c, h, w), jnp.float32)   # NCHW input
    params = init_params(k_p, c, h, w, outputs)

    out = jax.block_until_ready(dqn_forward(params, x))
    ref = jax.block_until_ready(dqn_reference(params, x))
    assert out.shape == (batch, outputs), out.shape
    # Kernel uses bf16 matmul operands (f32 accumulation + f32 epilogues),
    # reference is full f32 -> compare with bf16-appropriate tolerance.
    assert jnp.allclose(out, ref, rtol=3e-2, atol=3e-2), (out, ref)

    print("KERNEL_OK")
</pallas_src>

<mosaic_0001>
module attributes {stable_mosaic.version = 11 : i64} {
  func.func @_dqn_fused_kernel(%arg0: i32, %arg1: memref<1x72x100xbf16, #tpu.memory_space<vmem>>, %arg2: memref<100x16xbf16, #tpu.memory_space<vmem>>, %arg3: memref<1x16xf32, #tpu.memory_space<vmem>>, %arg4: memref<1x16xf32, #tpu.memory_space<vmem>>, %arg5: memref<400x32xbf16, #tpu.memory_space<vmem>>, %arg6: memref<1x32xf32, #tpu.memory_space<vmem>>, %arg7: memref<1x32xf32, #tpu.memory_space<vmem>>, %arg8: memref<32x128xbf16, #tpu.memory_space<vmem>>, %arg9: memref<1x128xf32, #tpu.memory_space<vmem>>, %arg10: memref<128x128xbf16, #tpu.memory_space<vmem>>, %arg11: memref<1x128xf32, #tpu.memory_space<vmem>>, %arg12: memref<1x2x128xf32, #tpu.memory_space<vmem>>, %arg13: memref<2x400xf32, #tpu.memory_space<vmem>>) attributes {dimension_semantics = [#tpu.dimension_semantics<parallel>], iteration_bounds = array<i64: 1>, scalar_prefetch = 0 : i64, scratch_operands = 1 : i64, tpu.core_type = #tpu.core_type<tc>, window_params = [{transform_indices = @transform_0, window_bounds = array<i64: 1, 72, 100>}, {pipeline_mode = #tpu.pipeline_mode<synchronous>, transform_indices = @transform_1, window_bounds = array<i64: 100, 16>}, {pipeline_mode = #tpu.pipeline_mode<synchronous>, transform_indices = @transform_2, window_bounds = array<i64: 1, 16>}, {pipeline_mode = #tpu.pipeline_mode<synchronous>, transform_indices = @transform_3, window_bounds = array<i64: 1, 16>}, {pipeline_mode = #tpu.pipeline_mode<synchronous>, transform_indices = @transform_4, window_bounds = array<i64: 400, 32>}, {pipeline_mode = #tpu.pipeline_mode<synchronous>, transform_indices = @transform_5, window_bounds = array<i64: 1, 32>}, {pipeline_mode = #tpu.pipeline_mode<synchronous>, transform_indices = @transform_6, window_bounds = array<i64: 1, 32>}, {pipeline_mode = #tpu.pipeline_mode<synchronous>, transform_indices = @transform_7, window_bounds = array<i64: 32, 128>}, {pipeline_mode = #tpu.pipeline_mode<synchronous>, transform_indices = @transform_8, window_bounds = array<i64: 1, 128>}, {pipeline_mode = #tpu.pipeline_mode<synchronous>, transform_indices = @transform_9, window_bounds = array<i64: 128, 128>}, {pipeline_mode = #tpu.pipeline_mode<synchronous>, transform_indices = @transform_10, window_bounds = array<i64: 1, 128>}, {transform_indices = @transform_11, window_bounds = array<i64: 1, 2, 128>}]} {
    %c0 = arith.constant 0 : index
    %c0_0 = arith.constant 0 : index
    %c0_1 = arith.constant 0 : index
    %0 = vector.load %arg1[%c0, %c0_0, %c0_1] : memref<1x72x100xbf16, #tpu.memory_space<vmem>>, vector<1x72x100xbf16>
    %1 = vector.shape_cast %0 : vector<1x72x100xbf16> to vector<72x100xbf16>
    %c0_2 = arith.constant 0 : index
    %c0_3 = arith.constant 0 : index
    %2 = vector.load %arg2[%c0_2, %c0_3] : memref<100x16xbf16, #tpu.memory_space<vmem>>, vector<100x16xbf16>
    %cst = arith.constant dense<0.000000e+00> : vector<72x16xf32>
    %3 = tpu.matmul %1, %2, %cst {dimension_numbers = #tpu.dot_dimension_numbers<[1], [0], [0], [1], [0, 0, 1, 1], [], []>} : vector<72x100xbf16>, vector<100x16xbf16>, vector<72x16xf32> -> vector<72x16xf32>
    %c0_4 = arith.constant 0 : index
    %c0_5 = arith.constant 0 : index
    %4 = vector.load %arg3[%c0_4, %c0_5] : memref<1x16xf32, #tpu.memory_space<vmem>>, vector<1x16xf32>
    %5 = vector.broadcast %4 : vector<1x16xf32> to vector<72x16xf32>
    %6 = arith.mulf %3, %5 : vector<72x16xf32>
    %c0_6 = arith.constant 0 : index
    %c0_7 = arith.constant 0 : index
    %7 = vector.load %arg4[%c0_6, %c0_7] : memref<1x16xf32, #tpu.memory_space<vmem>>, vector<1x16xf32>
    %8 = vector.broadcast %7 : vector<1x16xf32> to vector<72x16xf32>
    %9 = arith.addf %6, %8 : vector<72x16xf32>
    %cst_8 = arith.constant 0.000000e+00 : f32
    %10 = vector.broadcast %cst_8 : f32 to vector<72x16xf32>
    %11 = arith.maximumf %9, %10 : vector<72x16xf32>
    %c0_9 = arith.constant 0 : index
    %c0_10 = arith.constant 0 : index
    %12 = vector.load %arg5[%c0_9, %c0_10] : memref<400x32xbf16, #tpu.memory_space<vmem>>, vector<400x32xbf16>
    %c0_11 = arith.constant 0 : index
    %c0_12 = arith.constant 0 : index
    %13 = vector.load %arg6[%c0_11, %c0_12] : memref<1x32xf32, #tpu.memory_space<vmem>>, vector<1x32xf32>
    %c0_13 = arith.constant 0 : index
    %c0_14 = arith.constant 0 : index
    %14 = vector.load %arg7[%c0_13, %c0_14] : memref<1x32xf32, #tpu.memory_space<vmem>>, vector<1x32xf32>
    %c0_15 = arith.constant 0 : index
    %c0_16 = arith.constant 0 : index
    %15 = vector.load %arg8[%c0_15, %c0_16] : memref<32x128xbf16, #tpu.memory_space<vmem>>, vector<32x128xbf16>
    %c0_17 = arith.constant 0 : index
    %c0_18 = arith.constant 0 : index
    %16 = vector.load %arg10[%c0_17, %c0_18] : memref<128x128xbf16, #tpu.memory_space<vmem>>, vector<128x128xbf16>
    %17 = vector.extract_strided_slice %11 {offsets = [0, 0], sizes = [2, 16], strides = [1, 1]} : vector<72x16xf32> to vector<2x16xf32>
    %c0_19 = arith.constant 0 : index
    %c0_20 = arith.constant 0 : index
    %18 = vector.load %arg13[%c0_19, %c0_20] : memref<2x400xf32, #tpu.memory_space<vmem>>, vector<2x16xf32>
    tpu.vector_store %arg13[%c0_19, %c0_20], %17 {strides = array<i32>} : memref<2x400xf32, #tpu.memory_space<vmem>>, vector<2x16xf32>,
    %19 = vector.extract_strided_slice %11 {offsets = [2, 0], sizes = [2, 16], strides = [1, 1]} : vector<72x16xf32> to vector<2x16xf32>
    %c0_21 = arith.constant 0 : index
    %c16 = arith.constant 16 : index
    %20 = vector.load %arg13[%c0_21, %c16] : memref<2x400xf32, #tpu.memory_space<vmem>>, vector<2x16xf32>
    tpu.vector_store %arg13[%c0_21, %c16], %19 {strides = array<i32>} : memref<2x400xf32, #tpu.memory_space<vmem>>, vector<2x16xf32>,
    %21 = vector.extract_strided_slice %11 {offsets = [4, 0], sizes = [2, 16], strides = [1, 1]} : vector<72x16xf32> to vector<2x16xf32>
    %c0_22 = arith.constant 0 : index
    %c32 = arith.constant 32 : index
    %22 = vector.load %arg13[%c0_22, %c32] : memref<2x400xf32, #tpu.memory_space<vmem>>, vector<2x16xf32>
    tpu.vector_store %arg13[%c0_22, %c32], %21 {strides = array<i32>} : memref<2x400xf32, #tpu.memory_space<vmem>>, vector<2x16xf32>,
    %23 = vector.extract_strided_slice %11 {offsets = [6, 0], sizes = [2, 16], strides = [1, 1]} : vector<72x16xf32> to vector<2x16xf32>
    %c0_23 = arith.constant 0 : index
    %c48 = arith.constant 48 : index
    %24 = vector.load %arg13[%c0_23, %c48] : memref<2x400xf32, #tpu.memory_space<vmem>>, vector<2x16xf32>
    tpu.vector_store %arg13[%c0_23, %c48], %23 {strides = array<i32>} : memref<2x400xf32, #tpu.memory_space<vmem>>, vector<2x16xf32>,
    %25 = vector.extract_strided_slice %11 {offsets = [8, 0], sizes = [2, 16], strides = [1, 1]} : vector<72x16xf32> to vector<2x16xf32>
    %c0_24 = arith.constant 0 : index
    %c64 = arith.constant 64 : index
    %26 = vector.load %arg13[%c0_24, %c64] : memref<2x400xf32, #tpu.memory_space<vmem>>, vector<2x16xf32>
    tpu.vector_store %arg13[%c0_24, %c64], %25 {strides = array<i32>} : memref<2x400xf32, #tpu.memory_space<vmem>>, vector<2x16xf32>,
    %27 = vector.extract_strided_slice %11 {offsets = [12, 0], sizes = [2, 16], strides = [1, 1]} : vector<72x16xf32> to vector<2x16xf32>
    %c0_25 = arith.constant 0 : index
    %c80 = arith.constant 80 : index
    %28 = vector.load %arg13[%c0_25, %c80] : memref<2x400xf32, #tpu.memory_space<vmem>>, vector<2x16xf32>
    tpu.vector_store %arg13[%c0_25, %c80], %27 {strides = array<i32>} : memref<2x400xf32, #tpu.memory_space<vmem>>, vector<2x16xf32>,
    %29 = vector.extract_strided_slice %11 {offsets = [14, 0], sizes = [2, 16], strides = [1, 1]} : vector<72x16xf32> to vector<2x16xf32>
    %c0_26 = arith.constant 0 : index
    %c96 = arith.constant 96 : index
    %30 = vector.load %arg13[%c0_26, %c96] : memref<2x400xf32, #tpu.memory_space<vmem>>, vector<2x16xf32>
    tpu.vector_store %arg13[%c0_26, %c96], %29 {strides = array<i32>} : memref<2x400xf32, #tpu.memory_space<vmem>>, vector<2x16xf32>,
    %31 = vector.extract_strided_slice %11 {offsets = [16, 0], sizes = [2, 16], strides = [1, 1]} : vector<72x16xf32> to vector<2x16xf32>
    %c0_27 = arith.constant 0 : index
    %c112 = arith.constant 112 : index
    %32 = vector.load %arg13[%c0_27, %c112] : memref<2x400xf32, #tpu.memory_space<vmem>>, vector<2x16xf32>
    tpu.vector_store %arg13[%c0_27, %c112], %31 {strides = array<i32>} : memref<2x400xf32, #tpu.memory_space<vmem>>, vector<2x16xf32>,
    %33 = vector.extract_strided_slice %11 {offsets = [18, 0], sizes = [2, 16], strides = [1, 1]} : vector<72x16xf32> to vector<2x16xf32>
    %c0_28 = arith.constant 0 : index
    %c128 = arith.constant 128 : index
    %34 = vector.load %arg13[%c0_28, %c128] : memref<2x400xf32, #tpu.memory_space<vmem>>, vector<2x16xf32>
    tpu.vector_store %arg13[%c0_28, %c128], %33 {strides = array<i32>} : memref<2x400xf32, #tpu.memory_space<vmem>>, vector<2x16xf32>,
    %35 = vector.extract_strided_slice %11 {offsets = [20, 0], sizes = [2, 16], strides = [1, 1]} : vector<72x16xf32> to vector<2x16xf32>
    %c0_29 = arith.constant 0 : index
    %c144 = arith.constant 144 : index
    %36 = vector.load %arg13[%c0_29, %c144] : memref<2x400xf32, #tpu.memory_space<vmem>>, vector<2x16xf32>
    tpu.vector_store %arg13[%c0_29, %c144], %35 {strides = array<i32>} : memref<2x400xf32, #tpu.memory_space<vmem>>, vector<2x16xf32>,
    %37 = vector.extract_strided_slice %11 {offsets = [24, 0], sizes = [2, 16], strides = [1, 1]} : vector<72x16xf32> to vector<2x16xf32>
    %c0_30 = arith.constant 0 : index
    %c160 = arith.constant 160 : index
    %38 = vector.load %arg13[%c0_30, %c160] : memref<2x400xf32, #tpu.memory_space<vmem>>, vector<2x16xf32>
    tpu.vector_store %arg13[%c0_30, %c160], %37 {strides = array<i32>} : memref<2x400xf32, #tpu.memory_space<vmem>>, vector<2x16xf32>,
    %39 = vector.extract_strided_slice %11 {offsets = [26, 0], sizes = [2, 16], strides = [1, 1]} : vector<72x16xf32> to vector<2x16xf32>
    %c0_31 = arith.constant 0 : index
    %c176 = arith.constant 176 : index
    %40 = vector.load %arg13[%c0_31, %c176] : memref<2x400xf32, #tpu.memory_space<vmem>>, vector<2x16xf32>
    tpu.vector_store %arg13[%c0_31, %c176], %39 {strides = array<i32>} : memref<2x400xf32, #tpu.memory_space<vmem>>, vector<2x16xf32>,
    %41 = vector.extract_strided_slice %11 {offsets = [28, 0], sizes = [2, 16], strides = [1, 1]} : vector<72x16xf32> to vector<2x16xf32>
    %c0_32 = arith.constant 0 : index
    %c192 = arith.constant 192 : index
    %42 = vector.load %arg13[%c0_32, %c192] : memref<2x400xf32, #tpu.memory_space<vmem>>, vector<2x16xf32>
    tpu.vector_store %arg13[%c0_32, %c192], %41 {strides = array<i32>} : memref<2x400xf32, #tpu.memory_space<vmem>>, vector<2x16xf32>,
    %43 = vector.extract_strided_slice %11 {offsets = [30, 0], sizes = [2, 16], strides = [1, 1]} : vector<72x16xf32> to vector<2x16xf32>
    %c0_33 = arith.constant 0 : index
    %c208 = arith.constant 208 : index
    %44 = vector.load %arg13[%c0_33, %c208] : memref<2x400xf32, #tpu.memory_space<vmem>>, vector<2x16xf32>
    tpu.vector_store %arg13[%c0_33, %c208], %43 {strides = array<i32>} : memref<2x400xf32, #tpu.memory_space<vmem>>, vector<2x16xf32>,
    %45 = vector.extract_strided_slice %11 {offsets = [32, 0], sizes = [2, 16], strides = [1, 1]} : vector<72x16xf32> to vector<2x16xf32>
    %c0_34 = arith.constant 0 : index
    %c224 = arith.constant 224 : index
    %46 = vector.load %arg13[%c0_34, %c224] : memref<2x400xf32, #tpu.memory_space<vmem>>, vector<2x16xf32>
    tpu.vector_store %arg13[%c0_34, %c224], %45 {strides = array<i32>} : memref<2x400xf32, #tpu.memory_space<vmem>>, vector<2x16xf32>,
    %47 = vector.extract_strided_slice %11 {offsets = [36, 0], sizes = [2, 16], strides = [1, 1]} : vector<72x16xf32> to vector<2x16xf32>
    %c0_35 = arith.constant 0 : index
    %c240 = arith.constant 240 : index
    %48 = vector.load %arg13[%c0_35, %c240] : memref<2x400xf32, #tpu.memory_space<vmem>>, vector<2x16xf32>
    tpu.vector_store %arg13[%c0_35, %c240], %47 {strides = array<i32>} : memref<2x400xf32, #tpu.memory_space<vmem>>, vector<2x16xf32>,
    %49 = vector.extract_strided_slice %11 {offsets = [38, 0], sizes = [2, 16], strides = [1, 1]} : vector<72x16xf32> to vector<2x16xf32>
    %c0_36 = arith.constant 0 : index
    %c256 = arith.constant 256 : index
    %50 = vector.load %arg13[%c0_36, %c256] : memref<2x400xf32, #tpu.memory_space<vmem>>, vector<2x16xf32>
    tpu.vector_store %arg13[%c0_36, %c256], %49 {strides = array<i32>} : memref<2x400xf32, #tpu.memory_space<vmem>>, vector<2x16xf32>,
    %51 = vector.extract_strided_slice %11 {offsets = [40, 0], sizes = [2, 16], strides = [1, 1]} : vector<72x16xf32> to vector<2x16xf32>
    %c0_37 = arith.constant 0 : index
    %c272 = arith.constant 272 : index
    %52 = vector.load %arg13[%c0_37, %c272] : memref<2x400xf32, #tpu.memory_space<vmem>>, vector<2x16xf32>
    tpu.vector_store %arg13[%c0_37, %c272], %51 {strides = array<i32>} : memref<2x400xf32, #tpu.memory_space<vmem>>, vector<2x16xf32>,
    %53 = vector.extract_strided_slice %11 {offsets = [42, 0], sizes = [2, 16], strides = [1, 1]} : vector<72x16xf32> to vector<2x16xf32>
    %c0_38 = arith.constant 0 : index
    %c288 = arith.constant 288 : index
    %54 = vector.load %arg13[%c0_38, %c288] : memref<2x400xf32, #tpu.memory_space<vmem>>, vector<2x16xf32>
    tpu.vector_store %arg13[%c0_38, %c288], %53 {strides = array<i32>} : memref<2x400xf32, #tpu.memory_space<vmem>>, vector<2x16xf32>,
    %55 = vector.extract_strided_slice %11 {offsets = [44, 0], sizes = [2, 16], strides = [1, 1]} : vector<72x16xf32> to vector<2x16xf32>
    %c0_39 = arith.constant 0 : index
    %c304 = arith.constant 304 : index
    %56 = vector.load %arg13[%c0_39, %c304] : memref<2x400xf32, #tpu.memory_space<vmem>>, vector<2x16xf32>
    tpu.vector_store %arg13[%c0_39, %c304], %55 {strides = array<i32>} : memref<2x400xf32, #tpu.memory_space<vmem>>, vector<2x16xf32>,
    %57 = vector.extract_strided_slice %11 {offsets = [48, 0], sizes = [2, 16], strides = [1, 1]} : vector<72x16xf32> to vector<2x16xf32>
    %c0_40 = arith.constant 0 : index
    %c320 = arith.constant 320 : index
    %58 = vector.load %arg13[%c0_40, %c320] : memref<2x400xf32, #tpu.memory_space<vmem>>, vector<2x16xf32>
    tpu.vector_store %arg13[%c0_40, %c320], %57 {strides = array<i32>} : memref<2x400xf32, #tpu.memory_space<vmem>>, vector<2x16xf32>,
    %59 = vector.extract_strided_slice %11 {offsets = [50, 0], sizes = [2, 16], strides = [1, 1]} : vector<72x16xf32> to vector<2x16xf32>
    %c0_41 = arith.constant 0 : index
    %c336 = arith.constant 336 : index
    %60 = vector.load %arg13[%c0_41, %c336] : memref<2x400xf32, #tpu.memory_space<vmem>>, vector<2x16xf32>
    tpu.vector_store %arg13[%c0_41, %c336], %59 {strides = array<i32>} : memref<2x400xf32, #tpu.memory_space<vmem>>, vector<2x16xf32>,
    %61 = vector.extract_strided_slice %11 {offsets = [52, 0], sizes = [2, 16], strides = [1, 1]} : vector<72x16xf32> to vector<2x16xf32>
    %c0_42 = arith.constant 0 : index
    %c352 = arith.constant 352 : index
    %62 = vector.load %arg13[%c0_42, %c352] : memref<2x400xf32, #tpu.memory_space<vmem>>, vector<2x16xf32>
    tpu.vector_store %arg13[%c0_42, %c352], %61 {strides = array<i32>} : memref<2x400xf32, #tpu.memory_space<vmem>>, vector<2x16xf32>,
    %63 = vector.extract_strided_slice %11 {offsets = [54, 0], sizes = [2, 16], strides = [1, 1]} : vector<72x16xf32> to vector<2x16xf32>
    %c0_43 = arith.constant 0 : index
    %c368 = arith.constant 368 : index
    %64 = vector.load %arg13[%c0_43, %c368] : memref<2x400xf32, #tpu.memory_space<vmem>>, vector<2x16xf32>
    tpu.vector_store %arg13[%c0_43, %c368], %63 {strides = array<i32>} : memref<2x400xf32, #tpu.memory_space<vmem>>, vector<2x16xf32>,
    %65 = vector.extract_strided_slice %11 {offsets = [56, 0], sizes = [2, 16], strides = [1, 1]} : vector<72x16xf32> to vector<2x16xf32>
    %c0_44 = arith.constant 0 : index
    %c384 = arith.constant 384 : index
    %66 = vector.load %arg13[%c0_44, %c384] : memref<2x400xf32, #tpu.memory_space<vmem>>, vector<2x16xf32>
    tpu.vector_store %arg13[%c0_44, %c384], %65 {strides = array<i32>} : memref<2x400xf32, #tpu.memory_space<vmem>>, vector<2x16xf32>,
    %c0_45 = arith.constant 0 : index
    %c0_46 = arith.constant 0 : index
    %67 = vector.load %arg13[%c0_45, %c0_46] : memref<2x400xf32, #tpu.memory_space<vmem>>, vector<2x400xf32>
    %68 = arith.truncf %67 : vector<2x400xf32> to vector<2x400xbf16>
    %cst_47 = arith.constant dense<0.000000e+00> : vector<2x32xf32>
    %69 = tpu.matmul %68, %12, %cst_47 {dimension_numbers = #tpu.dot_dimension_numbers<[1], [0], [0], [1], [0, 0, 1, 1], [], []>} : vector<2x400xbf16>, vector<400x32xbf16>, vector<2x32xf32> -> vector<2x32xf32>
    %70 = vector.broadcast %13 : vector<1x32xf32> to vector<2x32xf32>
    %71 = arith.mulf %69, %70 : vector<2x32xf32>
    %72 = vector.broadcast %14 : vector<1x32xf32> to vector<2x32xf32>
    %73 = arith.addf %71, %72 : vector<2x32xf32>
    %cst_48 = arith.constant 0.000000e+00 : f32
    %74 = vector.broadcast %cst_48 : f32 to vector<2x32xf32>
    %75 = arith.maximumf %73, %74 : vector<2x32xf32>
    %76 = arith.truncf %75 : vector<2x32xf32> to vector<2x32xbf16>
    %cst_49 = arith.constant dense<0.000000e+00> : vector<2x128xf32>
    %77 = tpu.matmul %76, %15, %cst_49 {dimension_numbers = #tpu.dot_dimension_numbers<[1], [0], [0], [1], [0, 0, 1, 1], [], []>} : vector<2x32xbf16>, vector<32x128xbf16>, vector<2x128xf32> -> vector<2x128xf32>
    %c0_50 = arith.constant 0 : index
    %c0_51 = arith.constant 0 : index
    %78 = vector.load %arg9[%c0_50, %c0_51] : memref<1x128xf32, #tpu.memory_space<vmem>>, vector<1x128xf32>
    %79 = vector.broadcast %78 : vector<1x128xf32> to vector<2x128xf32>
    %80 = arith.addf %77, %79 : vector<2x128xf32>
    %cst_52 = arith.constant 0.000000e+00 : f32
    %81 = vector.broadcast %cst_52 : f32 to vector<2x128xf32>
    %82 = arith.maximumf %80, %81 : vector<2x128xf32>
    %83 = arith.truncf %82 : vector<2x128xf32> to vector<2x128xbf16>
    %cst_53 = arith.constant dense<0.000000e+00> : vector<2x128xf32>
    %84 = tpu.matmul %83, %16, %cst_53 {dimension_numbers = #tpu.dot_dimension_numbers<[1], [0], [0], [1], [0, 0, 1, 1], [], []>} : vector<2x128xbf16>, vector<128x128xbf16>, vector<2x128xf32> -> vector<2x128xf32>
    %c0_54 = arith.constant 0 : index
    %c0_55 = arith.constant 0 : index
    %85 = vector.load %arg11[%c0_54, %c0_55] : memref<1x128xf32, #tpu.memory_space<vmem>>, vector<1x128xf32>
    %86 = vector.broadcast %85 : vector<1x128xf32> to vector<2x128xf32>
    %87 = arith.addf %84, %86 : vector<2x128xf32>
    %c0_56 = arith.constant 0 : index
    %c0_57 = arith.constant 0 : index
    %c0_58 = arith.constant 0 : index
    %88 = vector.load %arg12[%c0_56, %c0_57, %c0_58] : memref<1x2x128xf32, #tpu.memory_space<vmem>>, vector<1x2x128xf32>
    %89 = vector.shape_cast %88 : vector<1x2x128xf32> to vector<2x128xf32>
    %90 = vector.shape_cast %87 : vector<2x128xf32> to vector<1x2x128xf32>
    tpu.vector_store %arg12[%c0_56, %c0_57, %c0_58], %90 {strides = array<i32>} : memref<1x2x128xf32, #tpu.memory_space<vmem>>, vector<1x2x128xf32>,
    return
  }
  func.func @transform_0(%arg0: i32) -> (i32, i32, i32) {
    %c0_i32 = arith.constant 0 : i32
    %c0_i32_0 = arith.constant 0 : i32
    %c0_i32_1 = arith.constant 0 : i32
    return %arg0, %c0_i32, %c0_i32_0 : i32, i32, i32
  }
  func.func @transform_1(%arg0: i32) -> (i32, i32) {
    %c0_i32 = arith.constant 0 : i32
    %c0_i32_0 = arith.constant 0 : i32
    %c0_i32_1 = arith.constant 0 : i32
    return %c0_i32, %c0_i32_0 : i32, i32
  }
  func.func @transform_2(%arg0: i32) -> (i32, i32) {
    %c0_i32 = arith.constant 0 : i32
    %c0_i32_0 = arith.constant 0 : i32
    %c0_i32_1 = arith.constant 0 : i32
    return %c0_i32, %c0_i32_0 : i32, i32
  }
  func.func @transform_3(%arg0: i32) -> (i32, i32) {
    %c0_i32 = arith.constant 0 : i32
    %c0_i32_0 = arith.constant 0 : i32
    %c0_i32_1 = arith.constant 0 : i32
    return %c0_i32, %c0_i32_0 : i32, i32
  }
  func.func @transform_4(%arg0: i32) -> (i32, i32) {
    %c0_i32 = arith.constant 0 : i32
    %c0_i32_0 = arith.constant 0 : i32
    %c0_i32_1 = arith.constant 0 : i32
    return %c0_i32, %c0_i32_0 : i32, i32
  }
  func.func @transform_5(%arg0: i32) -> (i32, i32) {
    %c0_i32 = arith.constant 0 : i32
    %c0_i32_0 = arith.constant 0 : i32
    %c0_i32_1 = arith.constant 0 : i32
    return %c0_i32, %c0_i32_0 : i32, i32
  }
  func.func @transform_6(%arg0: i32) -> (i32, i32) {
    %c0_i32 = arith.constant 0 : i32
    %c0_i32_0 = arith.constant 0 : i32
    %c0_i32_1 = arith.constant 0 : i32
    return %c0_i32, %c0_i32_0 : i32, i32
  }
  func.func @transform_7(%arg0: i32) -> (i32, i32) {
    %c0_i32 = arith.constant 0 : i32
    %c0_i32_0 = arith.constant 0 : i32
    %c0_i32_1 = arith.constant 0 : i32
    return %c0_i32, %c0_i32_0 : i32, i32
  }
  func.func @transform_8(%arg0: i32) -> (i32, i32) {
    %c0_i32 = arith.constant 0 : i32
    %c0_i32_0 = arith.constant 0 : i32
    %c0_i32_1 = arith.constant 0 : i32
    return %c0_i32, %c0_i32_0 : i32, i32
  }
  func.func @transform_9(%arg0: i32) -> (i32, i32) {
    %c0_i32 = arith.constant 0 : i32
    %c0_i32_0 = arith.constant 0 : i32
    %c0_i32_1 = arith.constant 0 : i32
    return %c0_i32, %c0_i32_0 : i32, i32
  }
  func.func @transform_10(%arg0: i32) -> (i32, i32) {
    %c0_i32 = arith.constant 0 : i32
    %c0_i32_0 = arith.constant 0 : i32
    %c0_i32_1 = arith.constant 0 : i32
    return %c0_i32, %c0_i32_0 : i32, i32
  }
  func.func @transform_11(%arg0: i32) -> (i32, i32, i32) {
    %c0_i32 = arith.constant 0 : i32
    %c0_i32_0 = arith.constant 0 : i32
    %c0_i32_1 = arith.constant 0 : i32
    return %arg0, %c0_i32, %c0_i32_0 : i32, i32, i32
  }
}

</mosaic_0001>

<bundles_post_ra>
// kernel: _dqn_forward.1
= control target key start
LH: loop header
LB: loop body
LE: loop exit
PB: predicated region body
PF: predicated region fallthrough
CT: control target
= control target key end

     0   :  { %vm140_vm0 = vcmask 1041408   ;;  %s1357_s0 = inlined_call_operand.vmem [shape: bf16[1,72,100], index: 0, kind: input, shape index: {}]   ;;  %s1358_s1 = inlined_call_operand.vmem [shape: bf16[100,16], index: 1, kind: input, shape index: {}]   ;;  %s1359_s2 = inlined_call_operand.vmem [shape: f32[1,16], index: 2, kind: input, shape index: {}]   ;;  %s1360_s3 = inlined_call_operand.vmem [shape: f32[1,16], index: 3, kind: input, shape index: {}]   ;;  %s1361_s4 = inlined_call_operand.vmem [shape: bf16[400,32], index: 4, kind: input, shape index: {}]   ;;  %s1362_s5 = inlined_call_operand.vmem [shape: f32[1,32], index: 5, kind: input, shape index: {}]   ;;  %s1363_s6 = inlined_call_operand.vmem [shape: f32[1,32], index: 6, kind: input, shape index: {}]   ;;  %s1364_s7 = inlined_call_operand.vmem [shape: bf16[32,128], index: 7, kind: input, shape index: {}]   ;;  %s1365_s8 = inlined_call_operand.vmem [shape: f32[1,128], index: 8, kind: input, shape index: {}]   ;;  %s1366_s9 = inlined_call_operand.vmem [shape: bf16[128,128], index: 9, kind: input, shape index: {}]   ;;  %s1367_s10 = inlined_call_operand.vmem [shape: f32[1,128], index: 10, kind: input, shape index: {}]   ;;  %s1368_s11 = inlined_call_operand.hbm [shape: f32[1,2,128], index: 11, kind: output, shape index: {}]  }
   0x1   :  { %v61_v0 = vld [vmem:[%s1358_s1 + $0x30] sm:$0x3] }
   0x2   :  { %v110_v1 = vunpack.c.l.b16 %v61_v0 }
   0x4   :  { %v117_v2 = vpack.c.b16 %v110_v1, %v110_v1 }
   0x6   :  { %v142_v3 = vsel %vm140_vm0, %v117_v2, 0 }
   0x7   :  { %16 = vsyncpa [#allocation4], 0  ;;  %145 = vmatpush.bf16.msra.mxu0 %v142_v3  ;;  %v980_v4 = vld [vmem:[%s1358_s1 + $0x28] sm:$0xff]  ;;  %v979_v5 = vld [vmem:[%s1358_s1 + $0x20] sm:$0xff]  ;;  %vm124_vm1 = vcmask 818176   ;;  %vm280_vm2 = vcmask 123904  }
   0x8   :  { %v978_v6 = vld [vmem:[%s1358_s1 + $0x18] sm:$0xff]  ;;  %v977_v7 = vld [vmem:[%s1358_s1 + $0x10] sm:$0xff]  ;;  %v976_v8 = vld [vmem:[%s1358_s1 + $0x8] sm:$0xff]  ;;  %s1058_s23 = smov 64   ;;  %s1059_s24 = smov 48   ;;  %vm289_vm3 = vcmask 255104  }
   0x9   :  { %v975_v9 = vld [vmem:[%s1358_s1] sm:$0xff]  ;;  %v972_v11 = vld [vmem:[%s1357_s0 + $0x8] sm:$0xff]  ;;  %v973_v12 = vld [vmem:[%s1357_s0 + $0x10] sm:$0xff]  ;;  %s1060_s25 = smov 80   ;;  %s1061_s26 = smov 96   ;;  %vm297_vm4 = vcmask 386304  }
   0xa   :  { %v971_v10 = vld [vmem:[%s1357_s0] sm:$0xff]  ;;  %v974_v13 = vld [vmem:[%s1357_s0 + $0x18] sm:$0xff]  ;;  %s1062_s27 = smov 112   ;;  %vm305_vm5 = vcmask 517504   ;;  %vm311_vm6 = vcmask 648704   ;;  %vm319_vm7 = vcmask 779904  }
   0xb   :  { %146 = vmatpush.bf16.msra.mxu0 %v980_v4  ;;  %v1164_v14 = vld [vmem:[%s1359_s2] ss:$0 sm:$0xff]  ;;  %s1056_s2 = smov 16   ;;  %vm327_vm8 = vcmask 911104   ;;  %vm333_vm9 = vcmask 1042304   ;;  %vm601_vm10 = vcmask 130048  }
   0xc   :  { %v1169_v15 = vld [vmem:[%s1360_s3] ss:$0 sm:$0xff]  ;;  %s1057_s3 = smov 32   ;;  %vm683_vm11 = vcmask 261120   ;;  %s775_s19 = sshll.u32 %s1368_s11, 4  ;;  %s776_s19 = int_to_ptr.hbm [resolvable:$true] %s775_s19 }
   0xf   :  { %147 = vmatpush.bf16.msra.mxu0 %v979_v5 }
  0x13   :  { %148 = vmatpush.bf16.msra.mxu0 %v978_v6 }
  0x17   :  { %149 = vmatpush.bf16.msra.mxu0 %v977_v7 }
  0x1b   :  { %150 = vmatpush.bf16.msra.mxu0 %v976_v8 }
  0x1f   :  { %151 = vmatpush.bf16.msra.mxu0 %v975_v9 }
  0x22   :  { %824 = vmatmul.msk.bf16.vlgmr.msra.gmra.mxu0 %vm124_vm1, %v971_v10 }
  0x32   :  { %825 = vmatmul.msk.bf16.gmra.mxu0 %vm124_vm1, %v972_v11 }
  0x42   :  { %826 = vmatmul.msk.bf16.gmra.mxu0 %vm124_vm1, %v973_v12 }
  0x52   :  { %827 = vmatmul.msk.bf16.gmra.mxu0 %vm124_vm1, %v974_v13  ;;  %v988_v13 = vld [vmem:[%s1361_s4 + $0x38] sm:$0xff] }
  0x53   :  { %605 = vmatpush.bf16.msra.mxu1 %v988_v13 }
  0x9f   :  { %v153_v16 = vpop.f32.mrf.mxu0 }
  0xa0   :  { %v180_v17 = vmul.f32 %v1164_v14, %v153_v16  ;;  %v987_v16 = vld [vmem:[%s1361_s4 + $0x30] sm:$0xff] }
  0xa1   :  { %606 = vmatpush.bf16.msra.mxu1 %v987_v16 }
  0xa2   :  { %v192_v18 = vadd.f32 %v1169_v15, %v180_v17  ;;  %v995_v17 = vld [vmem:[%s1361_s4 + $0x70] sm:$0xff] }
  0xa4   :  { %v200_v19 = vmax.f32 %v192_v18, 0.0  ;;  %v1003_v18 = vld [vmem:[%s1361_s4 + $0xb0] sm:$0xff] }
  0xa6   :  { %283 = vst.sshfl [vmem:[#allocation1] sm:$0xff pattern:$0x73625140] %v200_v19 }
  0xa7   :  { %v155_v20 = vpop.f32.mrf.mxu0  ;;  %281 = vst.msk [vmem:[#allocation2] sm:$0x3] %vm280_vm2, %v200_v19 }
  0xa8   :  { %v181_v21 = vmul.f32 %v1164_v14, %v155_v20 }
  0xaa   :  { %v193_v24 = vadd.f32 %v1169_v15, %v181_v21  ;;  %v986_v21 = vld [vmem:[%s1361_s4 + $0x28] sm:$0xff] }
  0xab   :  { %607 = vmatpush.bf16.msra.mxu1 %v986_v21 }
  0xac   :  { %v201_v25 = vmax.f32 %v193_v24, 0.0  ;;  %v985_v24 = vld [vmem:[%s1361_s4 + $0x20] sm:$0xff] }
  0xad   :  { %v285_v22 = vld [vmem:[#allocation1 + $0x1] ss:$4 sm:$0xff] }
  0xae   :  { %291 = vst.sshfl [vmem:[#allocation1] sm:$0xff pattern:$0x73625140] %v200_v19  ;;  %286 = vrot.lane.b32.xlu0 %v285_v22, %s1056_s2  ;;  %v994_v22 = vld [vmem:[%s1361_s4 + $0x68] sm:$0xff] }
  0xaf   :  { %v158_v23 = vpop.f32.mrf.mxu0  ;;  %608 = vmatpush.bf16.msra.mxu1 %v985_v24 }
  0xb0   :  { %v182_v34 = vmul.f32 %v1164_v14, %v158_v23  ;;  %v1002_v23 = vld [vmem:[%s1361_s4 + $0xa8] sm:$0xff] }
  0xb2   :  { %v194_v38 = vadd.f32 %v1169_v15, %v182_v34  ;;  %v983_v34 = vld [vmem:[%s1361_s4 + $0x10] sm:$0xff] }
  0xb4   :  { %v202_v41 = vmax.f32 %v194_v38, 0.0  ;;  %v990_v38 = vld [vmem:[%s1361_s4 + $0x48] sm:$0xff] }
  0xb5   :  { %v293_v26 = vld [vmem:[#allocation1 + $0x2] ss:$4 sm:$0xff] }
  0xb6   :  { %299 = vst.sshfl [vmem:[#allocation1] sm:$0xff pattern:$0x73625140] %v200_v19  ;;  %294 = vrot.lane.b32.xlu1 %v293_v26, %s1057_s3  ;;  %308 = vrot.lane.b32.xlu0 %v201_v25, %s1058_s23  ;;  %v1001_v26 = vld [vmem:[%s1361_s4 + $0xa0] sm:$0xff] }
  0xb7   :  { %v160_v27 = vpop.f32.mrf.mxu0 }
  0xb8   :  { %v183_v28 = vmul.f32 %v1164_v14, %v160_v27 }
  0xba   :  { %v195_v29 = vadd.f32 %v1169_v15, %v183_v28 }
  0xbc   :  { %v203_v30 = vmax.f32 %v195_v29, 0.0  ;;  %v984_v29 = vld [vmem:[%s1361_s4 + $0x18] sm:$0xff] }
  0xbd   :  { %v301_v31 = vld [vmem:[#allocation1 + $0x3] ss:$4 sm:$0xff]  ;;  %609 = vmatpush.bf16.msra.mxu1 %v984_v29 }
  0xbe   :  { %313 = vst.sshfl [vmem:[#allocation1] sm:$0xff pattern:$0x73625140] %v201_v25  ;;  %302 = vrot.lane.b32.xlu0 %v301_v31, %s1059_s24  ;;  %348 = vrot.lane.b32.xlu2 %v203_v30, %s1057_s3  ;;  %v1000_v31 = vld [vmem:[%s1361_s4 + $0x98] sm:$0xff] }
  0xbf   :  { %v163_v32 = vpop.f32.mrf.mxu0 }
  0xc0   :  { %v184_v33 = vmul.f32 %v1164_v14, %v163_v32 }
  0xc1   :  { %610 = vmatpush.bf16.msra.mxu1 %v983_v34 }
  0xc2   :  { %v196_v35 = vadd.f32 %v1169_v15, %v184_v33 }
  0xc4   :  { %v204_v36 = vmax.f32 %v196_v35, 0.0  ;;  %v991_v35 = vld [vmem:[%s1361_s4 + $0x50] sm:$0xff] }
  0xc5   :  { %v315_v37 = vld [vmem:[#allocation1 + $0x2] ss:$4 sm:$0xff] }
  0xc6   :  { %321 = vst.sshfl [vmem:[#allocation1] sm:$0xff pattern:$0x73625140] %v201_v25  ;;  %316 = vrot.lane.b32.xlu0 %v315_v37, %s1060_s25  ;;  %374 = vrot.lane.b32.xlu1 %v204_v36, %s1061_s26  ;;  %v993_v25 = vld [vmem:[%s1361_s4 + $0x60] sm:$0xff]  ;;  %v982_v37 = vld [vmem:[%s1361_s4 + $0x8] sm:$0xff] }
  0xc7   :  { %v165_v39 = vpop.f32.mrf.mxu0  ;;  %611 = vmatpush.bf16.msra.mxu1 %v982_v37 }
  0xc8   :  { %v185_v40 = vmul.f32 %v1164_v14, %v165_v39  ;;  %v998_v39 = vld [vmem:[%s1361_s4 + $0x88] sm:$0xff] }
  0xca   :  { %v197_v42 = vadd.f32 %v1169_v15, %v185_v40  ;;  %v981_v40 = vld [vmem:[%s1361_s4] sm:$0xff] }
  0xcb   :  { %612 = vmatpush.bf16.msra.mxu1 %v981_v40 }
  0xcc   :  { %v205_v43 = vmax.f32 %v197_v42, 0.0  ;;  %v997_v42 = vld [vmem:[%s1361_s4 + $0x80] sm:$0xff] }
  0xcd   :  { %v323_v44 = vld [vmem:[#allocation1 + $0x3] ss:$4 sm:$0xff] }
  0xce   :  { %335 = vst.sshfl [vmem:[#allocation1] sm:$0xff pattern:$0x73625140] %v202_v41  ;;  %324 = vrot.lane.b32.xlu0 %v323_v44, %s1061_s26  ;;  %391 = vrot.lane.b32.xlu1 %v205_v43, %s1056_s2  ;;  %v1005_v44 = vld [vmem:[%s1361_s4 + $0xc0] sm:$0xff] }
  0xcf   :  { %v168_v46 = vpop.f32.mrf.mxu0  ;;  %651 = vmatpush.bf16.msrb.mxu1 %v1005_v44 }
  0xd0   :  { %v186_v47 = vmul.f32 %v1164_v14, %v168_v46 }
  0xd2   :  { %v198_v48 = vadd.f32 %v1169_v15, %v186_v47 }
  0xd4   :  { %v206_v49 = vmax.f32 %v198_v48, 0.0 }
  0xd5   :  { %v337_v45 = vld [vmem:[#allocation1 + $0x1] ss:$4 sm:$0xff] }
  0xd6   :  { %340 = vst.sshfl [vmem:[#allocation1] sm:$0xff pattern:$0x73625140] %v202_v41  ;;  %410 = vrot.lane.b32.xlu2 %v206_v49, %s1058_s23 }
  0xd7   :  { %339 = vst.msk [vmem:[#allocation2 + $0x2] sm:$0x3] %vm280_vm2, %v337_v45  ;;  %v170_v51 = vpop.f32.mrf.mxu0 }
  0xd8   :  { %v187_v52 = vmul.f32 %v1164_v14, %v170_v51  ;;  %v996_v14 = vld [vmem:[%s1361_s4 + $0x78] sm:$0xff] }
  0xd9   :  { %618 = vmatpush.bf16.msra.mxu2 %v996_v14 }
  0xda   :  { %v199_v53 = vadd.f32 %v1169_v15, %v187_v52  ;;  %v1004_v15 = vld [vmem:[%s1361_s4 + $0xb8] sm:$0xff] }
  0xdb   :  { %631 = vmatpush.bf16.msra.mxu3 %v1004_v15 }
  0xdc   :  { %v207_v54 = vmax.f32 %v199_v53, 0.0 }
  0xdd   :  { %v342_v50 = vld [vmem:[#allocation1 + $0x2] ss:$4 sm:$0xff]  ;;  %619 = vmatpush.bf16.msra.mxu2 %v995_v17 }
  0xde   :  { %343 = vrot.lane.b32.xlu0 %v342_v50, %s1056_s2  ;;  %352 = vst.sshfl [vmem:[#allocation1] sm:$0xff pattern:$0x73625140] %v203_v30  ;;  %v1009_v17 = vld [vmem:[%s1366_s9 + $0x8] sm:$0xff] }
  0xdf   :  { %435 = vst.msk [vmem:[#allocation2 + $0x6] sm:$0x3] %vm280_vm2, %v207_v54  ;;  %632 = vmatpush.bf16.msra.mxu3 %v1003_v18  ;;  %v48_v18 = vld [vmem:[%s1357_s0 + $0x20] sm:$0xf] }
  0xe1   :  { %620 = vmatpush.bf16.msra.mxu2 %v994_v22  ;;  %v1028_v22 = vld [vmem:[%s1365_s8] ss:$0 sm:$0xff] }
  0xe3   :  { %633 = vmatpush.bf16.msra.mxu3 %v1002_v23 }
  0xe5   :  { %v354_v55 = vld [vmem:[#allocation1 + $0x1] ss:$4 sm:$0xff]  ;;  %621 = vmatpush.bf16.msra.mxu2 %v993_v25 }
  0xe6   :  { %330 = vrot.lane.b32.xlu0 %v202_v41, %s1062_s27  ;;  %359 = vst.sshfl [vmem:[#allocation1] sm:$0xff pattern:$0x73625140] %v203_v30  ;;  %355 = vrot.lane.b32.xlu1 %v354_v55, %s1059_s24  ;;  %v989_v41 = vld [vmem:[%s1361_s4 + $0x40] sm:$0xff] }
  0xe7   :  { %634 = vmatpush.bf16.msra.mxu3 %v1001_v26 }
  0xeb   :  { %635 = vmatpush.bf16.msra.mxu3 %v1000_v31 }
  0xed   :  { %v361_v56 = vld [vmem:[#allocation1 + $0x2] ss:$4 sm:$0xff] }
  0xee   :  { %362 = vrot.lane.b32.xlu1 %v361_v56, %s1058_s23  ;;  %366 = vst.sshfl [vmem:[#allocation1] sm:$0xff pattern:$0x73625140] %v203_v30  ;;  %v992_v30 = vld [vmem:[%s1361_s4 + $0x58] sm:$0xff]  ;;  %v1007_v56 = vld [vmem:[%s1364_s7 + $0x8] sm:$0xff] }
  0xef   :  { %622 = vmatpush.bf16.msra.mxu2 %v992_v30  ;;  %v1029_v30 = vld [vmem:[%s1367_s10] ss:$0 sm:$0xff] }
  0xf3   :  { %623 = vmatpush.bf16.msra.mxu2 %v991_v35 }
  0xf5   :  { %v368_v57 = vld [vmem:[#allocation1 + $0x3] ss:$4 sm:$0xff] }
  0xf6   :  { %369 = vrot.lane.b32.xlu1 %v368_v57, %s1060_s25  ;;  %378 = vst.sshfl [vmem:[#allocation1] sm:$0xff pattern:$0x73625140] %v204_v36  ;;  %v1006_v57 = vld [vmem:[%s1364_s7] sm:$0xff] }
  0xf7   :  { %624 = vmatpush.bf16.msra.mxu2 %v990_v38 }
  0xfb   :  { %625 = vmatpush.bf16.msra.mxu2 %v989_v41 }
  0xfd   :  { %v380_v58 = vld [vmem:[#allocation1 + $0x2] ss:$4 sm:$0xff] }
  0xfe   :  { %385 = vst.sshfl [vmem:[#allocation1] sm:$0xff pattern:$0x73625140] %v204_v36  ;;  %381 = vrot.lane.b32.xlu1 %v380_v58, %s1062_s27  ;;  %v999_v36 = vld [vmem:[%s1361_s4 + $0x90] sm:$0xff]  ;;  %v1015_v58 = vld [vmem:[%s1366_s9 + $0x38] sm:$0xff] }
  0xff   :  { %636 = vmatpush.bf16.msra.mxu3 %v999_v36  ;;  %693 = vmatpush.bf16.msrb.mxu2 %v1007_v56 }
 0x103   :  { %637 = vmatpush.bf16.msra.mxu3 %v998_v39  ;;  %694 = vmatpush.bf16.msrb.mxu2 %v1006_v57 }
 0x105   :  { %v387_v59 = vld [vmem:[#allocation1 + $0x3] ss:$4 sm:$0xff] }
 0x106   :  { %395 = vst.sshfl [vmem:[#allocation1] sm:$0xff pattern:$0x73625140] %v205_v43 }
 0x107   :  { %389 = vst.msk [vmem:[#allocation2 + $0x4] sm:$0x3] %vm280_vm2, %v387_v59  ;;  %638 = vmatpush.bf16.msra.mxu3 %v997_v42  ;;  %v1014_v59 = vld [vmem:[%s1366_s9 + $0x30] sm:$0xff] }
 0x10b   :  { %754 = vmatpush.bf16.msrb.mxu3 %v1015_v58 }
 0x10d   :  { %v397_v60 = vld [vmem:[#allocation1 + $0x1] ss:$4 sm:$0xff] }
 0x10e   :  { %398 = vrot.lane.b32.xlu2 %v397_v60, %s1057_s3  ;;  %402 = vst.sshfl [vmem:[#allocation1] sm:$0xff pattern:$0x73625140] %v205_v43 }
 0x10f   :  { %755 = vmatpush.bf16.msrb.mxu3 %v1014_v59 }
 0x115   :  { %v404_v61 = vld [vmem:[#allocation1 + $0x2] ss:$4 sm:$0xff] }
 0x116   :  { %405 = vrot.lane.b32.xlu2 %v404_v61, %s1059_s24  ;;  %414 = vst.sshfl [vmem:[#allocation1] sm:$0xff pattern:$0x73625140] %v206_v49  ;;  %v1013_v61 = vld [vmem:[%s1366_s9 + $0x28] sm:$0xff] }
 0x117   :  { %756 = vmatpush.bf16.msrb.mxu3 %v1013_v61 }
 0x118   :  { %v349_v10 = vpop.permute.xlu2 %348 }
 0x11d   :  { %v416_v62 = vld [vmem:[#allocation1 + $0x1] ss:$4 sm:$0xff] }
 0x11e   :  { %417 = vrot.lane.b32.xlu2 %v416_v62, %s1060_s25  ;;  %421 = vst.sshfl [vmem:[#allocation1] sm:$0xff pattern:$0x73625140] %v206_v49  ;;  %v1012_v62 = vld [vmem:[%s1366_s9 + $0x20] sm:$0xff] }
 0x11f   :  { %757 = vmatpush.bf16.msrb.mxu3 %v1012_v62 }
 0x120   :  { %v287_v63 = vpop.permute.xlu0 %286 }
 0x121   :  { %290 = vst.msk [vmem:[#allocation2] sm:$0x3] %vm289_vm3, %v287_v63 }
 0x125   :  { %v423_v0 = vld [vmem:[#allocation1 + $0x2] ss:$4 sm:$0xff] }
 0x126   :  { %424 = vrot.lane.b32.xlu2 %v423_v0, %s1061_s26  ;;  %428 = vst.sshfl [vmem:[#allocation1] sm:$0xff pattern:$0x73625140] %v206_v49 }
 0x128   :  { %v295_v1 = vpop.permute.xlu1 %294  ;;  %v309_v2 = vpop.permute.xlu0 %308 }
 0x129   :  { %298 = vst.msk [vmem:[#allocation2] sm:$0x3] %vm297_vm4, %v295_v1 }
 0x12d   :  { %v430_v3 = vld [vmem:[#allocation1 + $0x3] ss:$4 sm:$0xff] }
 0x12e   :  { %431 = vrot.lane.b32.xlu2 %v430_v3, %s1062_s27 }
 0x130   :  { %v303_v4 = vpop.permute.xlu0 %302  ;;  %v411_v19 = vpop.permute.xlu2 %410 }
 0x131   :  { %306 = vst.msk [vmem:[#allocation2] sm:$0x3] %vm305_vm5, %v303_v4  ;;  %v1010_v4 = vld [vmem:[%s1366_s9 + $0x10] sm:$0xff] }
 0x132   :  { %312 = vst.msk [vmem:[#allocation2] sm:$0x3] %vm311_vm6, %v309_v2  ;;  %v1011_v2 = vld [vmem:[%s1366_s9 + $0x18] sm:$0xff] }
 0x133   :  { %758 = vmatpush.bf16.msrb.mxu3 %v1011_v2 }
 0x137   :  { %759 = vmatpush.bf16.msrb.mxu3 %v1010_v4 }
 0x138   :  { %v317_v5 = vpop.permute.xlu0 %316  ;;  %v375_v6 = vpop.permute.xlu1 %374 }
 0x139   :  { %320 = vst.msk [vmem:[#allocation2] sm:$0x3] %vm319_vm7, %v317_v5 }
 0x13b   :  { %760 = vmatpush.bf16.msrb.mxu3 %v1009_v17 }
 0x140   :  { %v325_v7 = vpop.permute.xlu0 %324  ;;  %v392_v8 = vpop.permute.xlu1 %391 }
 0x141   :  { %328 = vst.msk [vmem:[#allocation2] sm:$0x3] %vm327_vm8, %v325_v7 }
 0x142   :  { %394 = vst.msk [vmem:[#allocation2 + $0x4] sm:$0x3] %vm289_vm3, %v392_v8  ;;  %v1026_v8 = vld [vmem:[%s1362_s5] ss:$0 sm:$0xff] }
 0x150   :  { %v344_v9 = vpop.permute.xlu0 %343 }
 0x151   :  { %346 = vst.msk [vmem:[#allocation2 + $0x2] sm:$0x3] %vm289_vm3, %v344_v9 }
 0x152   :  { %351 = vst.msk [vmem:[#allocation2 + $0x2] sm:$0x3] %vm297_vm4, %v349_v10 }
 0x158   :  { %v331_v11 = vpop.permute.xlu0 %330  ;;  %v356_v12 = vpop.permute.xlu1 %355 }
 0x159   :  { %334 = vst.msk [vmem:[#allocation2] sm:$0x3] %vm333_vm9, %v331_v11  ;;  %v1027_v11 = vld [vmem:[%s1363_s6] ss:$0 sm:$0xff] }
 0x15a   :  { %358 = vst.msk [vmem:[#allocation2 + $0x2] sm:$0x3] %vm305_vm5, %v356_v12 }
 0x160   :  { %v363_v20 = vpop.permute.xlu1 %362 }
 0x161   :  { %365 = vst.msk [vmem:[#allocation2 + $0x2] sm:$0x3] %vm311_vm6, %v363_v20  ;;  %v1008_v20 = vld [vmem:[%s1366_s9] sm:$0xff]  ;;  %s1063_s9 = smov [#allocation3]  }
 0x162   :  { %761 = vmatpush.bf16.msrb.mxu3 %v1008_v20  ;;  %s773_s17 = sshll.u32 %s1063_s9, 4  ;;  %s774_s17 = int_to_ptr.vmem [resolvable:$true] %s773_s17 }
 0x168   :  { %v370_v27 = vpop.permute.xlu1 %369  ;;  %v399_v28 = vpop.permute.xlu2 %398 }
 0x169   :  { %372 = vst.msk [vmem:[#allocation2 + $0x2] sm:$0x3] %vm319_vm7, %v370_v27 }
 0x16a   :  { %377 = vst.msk [vmem:[#allocation2 + $0x2] sm:$0x3] %vm327_vm8, %v375_v6 }
 0x16b   :  { %401 = vst.msk [vmem:[#allocation2 + $0x4] sm:$0x3] %vm297_vm4, %v399_v28 }
 0x170   :  { %v382_v32 = vpop.permute.xlu1 %381  ;;  %v406_v33 = vpop.permute.xlu2 %405 }
 0x171   :  { %384 = vst.msk [vmem:[#allocation2 + $0x2] sm:$0x3] %vm333_vm9, %v382_v32 }
 0x172   :  { %408 = vst.msk [vmem:[#allocation2 + $0x4] sm:$0x3] %vm305_vm5, %v406_v33 }
 0x173   :  { %413 = vst.msk [vmem:[#allocation2 + $0x4] sm:$0x3] %vm311_vm6, %v411_v19  ;;  %v79_v19 = vunpack.c.l.b16 %v48_v18 }
 0x175   :  { %v84_v21 = vpack.c.b16 %v79_v19, %v79_v19 }
 0x177   :  { %828 = vmatmul.msk.bf16.gmra.mxu0 %vm124_vm1, %v84_v21 }
 0x178   :  { %v418_v43 = vpop.permute.xlu2 %417 }
 0x179   :  { %420 = vst.msk [vmem:[#allocation2 + $0x4] sm:$0x3] %vm319_vm7, %v418_v43 }
 0x180   :  { %v425_v45 = vpop.permute.xlu2 %424 }
 0x181   :  { %427 = vst.msk [vmem:[#allocation2 + $0x4] sm:$0x3] %vm327_vm8, %v425_v45 }
 0x188   :  { %v432_v46 = vpop.permute.xlu2 %431 }
 0x189   :  { %434 = vst.msk [vmem:[#allocation2 + $0x4] sm:$0x3] %vm333_vm9, %v432_v46 }
 0x190   :  { %v436_v47 = vld [vmem:[#allocation2] sm:$0xff] }
 0x191   :  { %438 = vst [vmem:[#allocation1] ss:$4 sm:$0xff] %v436_v47 }
 0x198   :  { %v439_v48 = vld.sshfl [vmem:[#allocation1] sm:$0xff pattern:$0x73625140]  ;;  %v440_v49 = vld.sshfl [vmem:[#allocation1 + $0x8] sm:$0xff pattern:$0x73625140] }
 0x199   :  { %v447_v50 = vpack.c.bf16 %v439_v48, %v439_v48  ;;  %v448_v51 = vpack.c.bf16 %v440_v49, %v440_v49  ;;  %v441_v52 = vld.sshfl [vmem:[#allocation1 + $0x10] sm:$0xff pattern:$0x73625140]  ;;  %v442_v54 = vld.sshfl [vmem:[#allocation1 + $0x18] sm:$0xff pattern:$0x73625140] }
 0x19a   :  { %v449_v53 = vpack.c.bf16 %v441_v52, %v441_v52  ;;  %v450_v55 = vpack.c.bf16 %v442_v54, %v442_v54 }
 0x19b   :  { %613 = vmatmul.bf16.vlgmr.msra.gmra.mxu1 %v447_v50  ;;  %626 = vmatmul.bf16.vlgmr.msra.gmra.mxu2 %v448_v51 }
 0x19c   :  { %639 = vmatmul.bf16.vlgmr.msra.gmra.mxu3 %v449_v53 }
 0x1ab   :  { %929 = vmatmul.msk.bf16.vlgmr.msrb.gmra.mxu1 %vm601_vm10, %v450_v55 }
 0x1f4   :  { %v173_v28 = vpop.f32.mrf.mxu0 }
 0x1fc   :  { %v174_v29 = vpop.f32.mrf.mxu0 }
 0x218   :  { %v614_v60 = vpop.f32.mrf.mxu1 }
 0x21e   :  { %v627_v63 = vpop.f32.mrf.mxu2 }
 0x21f   :  { %v640_v0 = vpop.f32.mrf.mxu3  ;;  %v628_v3 = vadd.f32 %v627_v63, %v614_v60 }
 0x220   :  { %v616_v1 = vpop.f32.mrf.mxu1 }
 0x221   :  { %v641_v6 = vadd.f32 %v640_v0, %v628_v3 }
 0x226   :  { %v629_v5 = vpop.f32.mrf.mxu2 }
 0x227   :  { %v642_v7 = vpop.f32.mrf.mxu3 }
 0x228   :  { %v653_v9 = vpop.f32.mrf.mxu1 }
 0x229   :  { %v654_v10 = vadd.f32 %v653_v9, %v641_v6 }
 0x22b   :  { %v660_v12 = vmul.f32 %v1026_v8, %v654_v10 }
 0x22d   :  { %v664_v13 = vadd.f32 %v1027_v11, %v660_v12 }
 0x22f   :  { %v665_v14 = vmax.f32 %v664_v13, 0.0 }
 0x230   :  { %v655_v15 = vpop.f32.mrf.mxu1 }
 0x231   :  { %v666_v16 = vpack.c.bf16 %v665_v14, %v665_v14 }
 0x233   :  { %938 = vmatmul.msk.bf16.vlgmr.msrb.gmra.mxu2 %vm683_vm11, %v666_v16 }
 0x2b6   :  { %v696_v23 = vpop.f32.mrf.mxu2 }
 0x2b7   :  { %v697_v24 = vadd.f32 %v1028_v22, %v696_v23 }
 0x2b9   :  { %v700_v25 = vmax.f32 %v697_v24, 0.0 }
 0x2bb   :  { %v701_v26 = vpack.c.bf16 %v700_v25, %v700_v25 }
 0x2bd   :  { %762 = vmatmul.bf16.vlgmr.msrb.gmra.mxu3 %v701_v26 }
 0x2be   :  { %v698_v27 = vpop.f32.mrf.mxu2 }
 0x340   :  { %v763_v31 = vpop.f32.mrf.mxu3 }
 0x341   :  { %v764_v32 = vadd.f32 %v1029_v30, %v763_v31 }
 0x343   :  { %767 = vst [vmem:[#allocation3] sm:$0x3] %v764_v32 }
 0x344   :  { %778 = dma.vmem_to_hbm [thread:$0]  %s774_s17, 32, %s776_s19, [#allocation4]  }
 0x348   :  { %v765_v33 = vpop.f32.mrf.mxu3 }
 0x349   :  { %1054 = dma.done.wait [#allocation4], 32  }
 0x34a   :  { %1055 = vsyncadd [#allocation4], 4294967264 }
 0x34b   :  { %783 = vsyncpa [#allocation4], 1 }

</bundles_post_ra>
